<compile_context>
chip_gen: v7x
topology: tpu7x:2x2x1
jax: 0.10.0
libtpu: 0.0.40
codegen_flags: <defaults>
</compile_context>

<pallas_src>
import functools

import jax
import jax.numpy as jnp
from jax import lax
from jax.experimental import pallas as pl
from jax.experimental.pallas import tpu as pltpu

_VMEM_LIMIT = 48 * 1024 * 1024  # > scoped default everywhere, < 64 MiB physical on v7x


def _round_up(x, m):
    return ((x + m - 1) // m) * m


def _pick_tk(kp, cap=8192):
    """Largest multiple of 128 <= cap that divides kp (kp is a multiple of 128)."""
    if kp <= cap:
        return kp
    t = cap
    while kp % t:
        t -= 128
    return t


# ----------------------------------------------------------------------------
# Fused matmul kernel: out = post(pre(A) @ W + b); optional BN sum/sumsq partials.
#   A:[G,Pp,Kp] bf16, W:[G,Kp,Cp] bf16, b:[1,Cp] f32 -> out [G,Pp,Cp] (bf16/f32),
#   stats [G, nm, 8, Cp] f32 (row 0 = sum over tile rows, row 1 = sumsq).
# ----------------------------------------------------------------------------
def _mm_kernel(a_ref, w_ref, b_ref, *rest, nk, pre, post, with_stats):
    if with_stats:
        o_ref, stats_ref, acc_ref = rest
    else:
        o_ref, acc_ref = rest
        stats_ref = None
    k = pl.program_id(3)

    @pl.when(k == 0)
    def _():
        acc_ref[...] = jnp.zeros_like(acc_ref)

    a = a_ref[0]
    if pre == "relu":
        a = jnp.maximum(a, 0)
    acc_ref[...] += jnp.dot(a, w_ref[0], preferred_element_type=jnp.float32)

    @pl.when(k == nk - 1)
    def _():
        out = acc_ref[...] + b_ref[...]
        if post == "leaky":
            out = jnp.where(out > 0, out, jnp.float32(0.2) * out)
        elif post == "tanh":
            out = jnp.tanh(out)
        o_ref[0] = out.astype(o_ref.dtype)
        if with_stats:
            # Pack BN partial sums into an (8, tn) slab: row0=sum, row1=sumsq.
            s1 = jnp.sum(out, axis=0)
            s2 = jnp.sum(out * out, axis=0)
            rows = lax.broadcasted_iota(jnp.int32, (8, out.shape[1]), 0)
            packed = jnp.where(rows == 0, s1[None, :],
                               jnp.where(rows == 1, s2[None, :], jnp.float32(0.0)))
            stats_ref[0, 0] = packed


def _matmul_fused(a, w, b, *, pre="none", post="none", want_stats=False,
                  out_dtype=jnp.bfloat16, tm_max=256):
    """a:[G,P,K] activations, w:[G,Kp,Cp] bf16 (pre-padded), b:[1,Cp] f32.
    Returns (out [G,Pp,Cp] padded, stats [G,nm,8,Cp] or None)."""
    G, P, K = a.shape
    Gw, Kp, Cp = w.shape
    assert Gw == G and K <= Kp and Kp % 128 == 0 and Cp % 128 == 0

    tm = min(tm_max, _round_up(P, 16))
    tn = 256 if Cp % 256 == 0 else 128
    tk = _pick_tk(Kp)              # K-resident whenever Kp <= 8192 (always, here)
    Pp = _round_up(P, tm)
    nm, nn, nk = Pp // tm, Cp // tn, Kp // tk

    a_p = jnp.pad(a.astype(jnp.bfloat16), ((0, 0), (0, Pp - P), (0, Kp - K)))

    out_shape = [jax.ShapeDtypeStruct((G, Pp, Cp), out_dtype)]
    out_specs = [pl.BlockSpec((1, tm, tn), lambda g, i, j, k: (g, i, j))]
    if want_stats:
        out_shape.append(jax.ShapeDtypeStruct((G, nm, 8, Cp), jnp.float32))
        out_specs.append(pl.BlockSpec((1, 1, 8, tn), lambda g, i, j, k: (g, i, 0, j)))

    cost = pl.CostEstimate(
        flops=int(2 * G * Pp * Kp * Cp),
        transcendentals=int(G * Pp * Cp) if post == "tanh" else 0,
        bytes_accessed=int(2 * G * (Pp * Kp + Kp * Cp)
                           + jnp.dtype(out_dtype).itemsize * G * Pp * Cp),
    )
    res = pl.pallas_call(
        functools.partial(_mm_kernel, nk=nk, pre=pre, post=post,
                          with_stats=want_stats),
        out_shape=tuple(out_shape) if want_stats else out_shape[0],
        grid=(G, nm, nn, nk),
        in_specs=[
            pl.BlockSpec((1, tm, tk), lambda g, i, j, k: (g, i, k)),
            pl.BlockSpec((1, tk, tn), lambda g, i, j, k: (g, k, j)),
            pl.BlockSpec((1, tn), lambda g, i, j, k: (0, j)),
        ],
        out_specs=tuple(out_specs) if want_stats else out_specs[0],
        scratch_shapes=[pltpu.VMEM((tm, tn), jnp.float32)],
        compiler_params=pltpu.CompilerParams(
            dimension_semantics=("parallel", "parallel", "parallel", "arbitrary"),
            vmem_limit_bytes=_VMEM_LIMIT,
        ),
        cost_estimate=cost,
    )(a_p, w, b)
    if want_stats:
        return res[0], res[1]
    return res, None


# ----------------------------------------------------------------------------
# BatchNorm: stats come fused from the producer matmul; apply is one tiled pass.
# ----------------------------------------------------------------------------
def _bn_scale_shift(stats, count, bn, eps=1e-5):
    gamma_p, beta_p = bn                       # padded (Cp,) f32; padded cols are 0
    s1 = jnp.sum(stats[:, :, 0, :], axis=(0, 1))
    s2 = jnp.sum(stats[:, :, 1, :], axis=(0, 1))
    mean = s1 / jnp.float32(count)
    var = s2 / jnp.float32(count) - mean * mean   # biased (training-mode BatchNorm2d)
    scale = gamma_p * lax.rsqrt(var + jnp.float32(eps))
    shift = beta_p - mean * scale
    return scale, shift


def _bn_apply_kernel(x_ref, sc_ref, sh_ref, o_ref, *, post):
    y = x_ref[...].astype(jnp.float32) * sc_ref[...] + sh_ref[...]
    if post == "leaky":
        y = jnp.where(y > 0, y, jnp.float32(0.2) * y)
    o_ref[...] = y.astype(o_ref.dtype)


def _bn_apply(x2, scale, shift, *, post="none", out_dtype=jnp.bfloat16, tp=2048):
    R, Cp = x2.shape
    tp = min(tp, _round_up(R, 16))
    Rp = _round_up(R, tp)
    x_p = jnp.pad(x2, ((0, Rp - R), (0, 0)))
    sc = scale.reshape(1, Cp).astype(jnp.float32)
    sh = shift.reshape(1, Cp).astype(jnp.float32)
    y = pl.pallas_call(
        functools.partial(_bn_apply_kernel, post=post),
        out_shape=jax.ShapeDtypeStruct((Rp, Cp), out_dtype),
        grid=(Rp // tp,),
        in_specs=[pl.BlockSpec((tp, Cp), lambda i: (i, 0)),
                  pl.BlockSpec((1, Cp), lambda i: (0, 0)),
                  pl.BlockSpec((1, Cp), lambda i: (0, 0))],
        out_specs=pl.BlockSpec((tp, Cp), lambda i: (i, 0)),
        compiler_params=pltpu.CompilerParams(
            dimension_semantics=("parallel",),
            vmem_limit_bytes=_VMEM_LIMIT,
        ),
    )(x_p, sc, sh)
    return y[:R]


# ----------------------------------------------------------------------------
# im2col via strided slices (no gathers) + conv wrappers.
# ----------------------------------------------------------------------------
def _extract_patches(x, k, stride, pad):
    """x:[N,H,W,C], pad=(top,bottom,left,right) -> [N*Ho*Wo, k*k*C] with (kh,kw,C)
    contraction ordering, built from strided slices + lane-dense concat."""
    N, H, W, C = x.shape
    pt, pb, pleft, pright = pad
    xp = jnp.pad(x, ((0, 0), (pt, pb), (pleft, pright), (0, 0)))
    Hp, Wp = H + pt + pb, W + pleft + pright
    Ho = (Hp - k) // stride + 1
    Wo = (Wp - k) // stride + 1
    slabs = []
    for dh in range(k):
        for dw in range(k):
            slabs.append(xp[:, dh:dh + (Ho - 1) * stride + 1:stride,
                            dw:dw + (Wo - 1) * stride + 1:stride, :])
    a = jnp.concatenate(slabs, axis=-1)          # [N,Ho,Wo,k*k*C]
    return a.reshape(N * Ho * Wo, k * k * C), (N, Ho, Wo)


# Phase table for ConvTranspose2d(k=4, s=2, p=1): output index 2i+parity reads the
# listed input (before, after) padding paired with the listed kernel taps.
_PHASE = {0: ((1, 0), (3, 1)),   # parity 0: inputs [i-1, i] <-> kernel rows [3, 1]
          1: ((0, 1), (2, 0))}   # parity 1: inputs [i, i+1] <-> kernel rows [2, 0]


def conv2d(x, cp, *, pre="none", post="none", bn=None, post_bn="none",
           out_dtype=jnp.bfloat16):
    """PyTorch Conv2d(k=4, s=2, p=1) (+ optional fused training-mode BatchNorm)."""
    cout = cp["cout"]
    a, (N, Ho, Wo) = _extract_patches(x, 4, 2, (1, 1, 1, 1))
    P = N * Ho * Wo
    mm_dtype = jnp.bfloat16 if bn is not None else out_dtype
    out, stats = _matmul_fused(a[None], cp["w"][None], cp["b"], pre=pre,
                               post=("none" if bn is not None else post),
                               want_stats=bn is not None, out_dtype=mm_dtype)
    _, Pp, Cp = out.shape
    if bn is not None:
        scale, shift = _bn_scale_shift(stats, P, bn)
        y = _bn_apply(out.reshape(Pp, Cp), scale, shift, post=post_bn,
                      out_dtype=out_dtype)
        return y[:P, :cout].reshape(N, Ho, Wo, cout)
    return out[0, :P, :cout].reshape(N, Ho, Wo, cout)


def conv_transpose2d(x, cp, *, pre="none", post="none", bn=None, post_bn="none",
                     out_dtype=jnp.bfloat16):
    """PyTorch ConvTranspose2d(k=4, s=2, p=1), phase-decomposed into 4 stride-1 2x2
    convolutions fused into ONE pallas_call (+ optional fused BatchNorm)."""
    cout = cp["cout"]
    N, H, W, C = x.shape
    phases = []
    for po in (0, 1):
        rt, rb = _PHASE[po][0]
        for pw in (0, 1):
            cl, cr = _PHASE[pw][0]
            a, _ = _extract_patches(x, 2, 1, (rt, rb, cl, cr))
            phases.append(a)
    a4 = jnp.stack(phases, axis=0)               # [4, P, 4*C]
    P = N * H * W
    mm_dtype = jnp.bfloat16 if bn is not None else out_dtype
    out, stats = _matmul_fused(a4, cp["w"], cp["b"], pre=pre,
                               post=("none" if bn is not None else post),
                               want_stats=bn is not None, out_dtype=mm_dtype)
    G, Pp, Cp = out.shape
    if bn is not None:
        scale, shift = _bn_scale_shift(stats, 4 * P, bn)
        out = _bn_apply(out.reshape(G * Pp, Cp), scale, shift, post=post_bn,
                        out_dtype=out_dtype)[:G * Pp].reshape(G, Pp, Cp)
    y = out[:, :P, :cout].reshape(2, 2, N, H, W, cout)
    return jnp.transpose(y, (2, 3, 0, 4, 1, 5)).reshape(N, 2 * H, 2 * W, cout)


# ----------------------------------------------------------------------------
# Parameter preparation (weight layout, bf16 cast, padding: hoisted out of fwd).
# ----------------------------------------------------------------------------
def _prep_conv_w(w_oihw):
    cout, cin, kh, kw = w_oihw.shape
    K = kh * kw * cin
    Kp, Cp = _round_up(K, 128), _round_up(cout, 128)
    wmat = jnp.transpose(w_oihw, (2, 3, 1, 0)).reshape(K, cout)
    return jnp.pad(wmat, ((0, Kp - K), (0, Cp - cout))).astype(jnp.bfloat16)


def _prep_convT_w(w_iohw):
    cin, cout = int(w_iohw.shape[0]), int(w_iohw.shape[1])
    K = 4 * cin
    Kp, Cp = _round_up(K, 128), _round_up(cout, 128)
    mats = []
    for po in (0, 1):
        khs = jnp.array(_PHASE[po][1])
        for pw in (0, 1):
            kws = jnp.array(_PHASE[pw][1])
            w_sub = jnp.take(jnp.take(w_iohw, khs, axis=2), kws, axis=3)  # [ci,co,2,2]
            wmat = jnp.transpose(w_sub, (2, 3, 0, 1)).reshape(K, cout)
            mats.append(jnp.pad(wmat, ((0, Kp - K), (0, Cp - cout))))
    return jnp.stack(mats, axis=0).astype(jnp.bfloat16)       # [4, Kp, Cp]


def _prep_bias(b, cout):
    Cp = _round_up(cout, 128)
    return jnp.pad(b.astype(jnp.float32), (0, Cp - cout)).reshape(1, Cp)


def _conv_params(w_oihw, bias=None):
    cout = int(w_oihw.shape[0])
    if bias is None:
        bias = jnp.zeros((cout,), jnp.float32)
    return {"w": _prep_conv_w(w_oihw), "b": _prep_bias(bias, cout), "cout": cout}


def _convT_params(w_iohw, bias=None):
    cout = int(w_iohw.shape[1])
    if bias is None:
        bias = jnp.zeros((cout,), jnp.float32)
    return {"w": _prep_convT_w(w_iohw), "b": _prep_bias(bias, cout), "cout": cout}


def _bn_params(c):
    Cp = _round_up(c, 128)
    gamma = jnp.pad(jnp.ones((c,), jnp.float32), (0, Cp - c))  # padded cols -> 0
    beta = jnp.zeros((Cp,), jnp.float32)
    return (gamma, beta)


def _init_conv(key, cout, cin, k=4, std=0.02):
    return std * jax.random.normal(key, (cout, cin, k, k), jnp.float32)


def _init_convT(key, cin, cout, k=4, std=0.02):
    return std * jax.random.normal(key, (cin, cout, k, k), jnp.float32)


def make_block_params(key, outer_nc, inner_nc, input_nc=None, sub=None,
                      outermost=False, innermost=False):
    if input_nc is None:
        input_nc = outer_nc
    k = jax.random.split(key, 3)
    p = {"outermost": outermost, "innermost": innermost, "sub": sub}
    # downconv: bias=False (norm_layer == BatchNorm2d in the reference module)
    p["down"] = _conv_params(_init_conv(k[0], inner_nc, input_nc))
    if outermost:
        up_b = 0.02 * jax.random.normal(k[2], (outer_nc,), jnp.float32)
        p["up"] = _convT_params(_init_convT(k[1], inner_nc * 2, outer_nc), up_b)
        p["down_bn"] = None
        p["up_bn"] = None
    elif innermost:
        p["up"] = _convT_params(_init_convT(k[1], inner_nc, outer_nc))
        p["down_bn"] = None
        p["up_bn"] = _bn_params(outer_nc)
    else:
        p["down_bn"] = _bn_params(inner_nc)
        p["up"] = _convT_params(_init_convT(k[1], inner_nc * 2, outer_nc))
        p["up_bn"] = _bn_params(outer_nc)
    return p


def make_unet_params(key, input_nc, output_nc, num_downs, ngf=64):
    keys = jax.random.split(key, num_downs)
    blk = make_block_params(keys[0], ngf * 8, ngf * 8, innermost=True)
    for i in range(num_downs - 5):
        blk = make_block_params(keys[1 + i], ngf * 8, ngf * 8, sub=blk)
    blk = make_block_params(keys[num_downs - 4], ngf * 4, ngf * 8, sub=blk)
    blk = make_block_params(keys[num_downs - 3], ngf * 2, ngf * 4, sub=blk)
    blk = make_block_params(keys[num_downs - 2], ngf, ngf * 2, sub=blk)
    blk = make_block_params(keys[num_downs - 1], output_nc, ngf,
                            input_nc=input_nc, sub=blk, outermost=True)
    return blk


def unet_forward(p, xa):
    """xa: NHWC bf16.  For non-outermost blocks xa is already
    leaky_relu(parent_output, 0.2) (fused into the parent's producer), which is
    exactly the tensor PyTorch's inplace LeakyReLU mutates before the skip concat."""
    if p["outermost"]:
        # down = [downconv]; the child's leading inplace LeakyReLU is fused as post.
        h = conv2d(xa, p["down"], post="leaky")
        h = unet_forward(p["sub"], h)
        # up = [ReLU, ConvTranspose2d, Tanh] (fused pre-relu / post-tanh), f32 out.
        return conv_transpose2d(h, p["up"], pre="relu", post="tanh",
                                out_dtype=jnp.float32)
    if p["innermost"]:
        # down = [leaky (already applied), downconv]
        h = conv2d(xa, p["down"])
        # up = [ReLU, ConvTranspose2d, BatchNorm] (BN stats fused in the matmul)
        h = conv_transpose2d(h, p["up"], pre="relu", bn=p["up_bn"])
        return jnp.concatenate([xa, h], axis=-1)
    # down = [leaky (already applied), downconv, BatchNorm(+fused child leaky)]
    h = conv2d(xa, p["down"], bn=p["down_bn"], post_bn="leaky")
    h = unet_forward(p["sub"], h)
    # up = [ReLU, ConvTranspose2d, BatchNorm]
    h = conv_transpose2d(h, p["up"], pre="relu", bn=p["up_bn"])
    return jnp.concatenate([xa, h], axis=-1)


# ----------------------------------------------------------------------------
# Pure-lax references for op-level numerical validation (f32).
# ----------------------------------------------------------------------------
def _ref_conv2d(x, w_oihw, b):
    y = lax.conv_general_dilated(
        x, jnp.transpose(w_oihw, (2, 3, 1, 0)), (2, 2), ((1, 1), (1, 1)),
        dimension_numbers=("NHWC", "HWIO", "NHWC"))
    return y + b


def _ref_conv_transpose2d(x, w_iohw, b):
    w_flip = w_iohw[:, :, ::-1, ::-1]
    w_hwio = jnp.transpose(w_flip, (2, 3, 0, 1))
    y = lax.conv_general_dilated(
        x, w_hwio, (1, 1), ((2, 2), (2, 2)), lhs_dilation=(2, 2),
        dimension_numbers=("NHWC", "HWIO", "NHWC"))
    return y + b


def _ref_bn(y, gamma, beta, eps=1e-5):
    mean = jnp.mean(y, axis=(0, 1, 2))
    var = jnp.mean((y - mean) ** 2, axis=(0, 1, 2))
    return (y - mean) * gamma * lax.rsqrt(var + eps) + beta


def _max_rel_err(got, ref):
    err = jnp.max(jnp.abs(got.astype(jnp.float32) - ref.astype(jnp.float32)))
    return float(err / (jnp.max(jnp.abs(ref)) + 1e-6))


# ----------------------------------------------------------------------------
if __name__ == "__main__":
    key = jax.random.PRNGKey(0)
    kp, kx, kv = jax.random.split(key, 3)

    # ---- op-level validation against lax references (bf16-level tolerance) ----
    kv1, kv2, kv3, kv4, kv5 = jax.random.split(kv, 5)
    xv = jax.random.normal(kv1, (2, 16, 16, 8), jnp.float32)
    wc = 0.1 * jax.random.normal(kv2, (16, 8, 4, 4), jnp.float32)       # OIHW
    wt = 0.1 * jax.random.normal(kv3, (16, 8, 4, 4), jnp.float32)       # IOHW
    bt = 0.1 * jax.random.normal(kv4, (8,), jnp.float32)
    gamma = 1.0 + 0.1 * jax.random.normal(kv5, (16,), jnp.float32)
    beta = 0.1 * jnp.ones((16,), jnp.float32)

    cp_c = _conv_params(wc)
    got = jax.jit(lambda x: conv2d(x, cp_c))(xv.astype(jnp.bfloat16))
    ref = _ref_conv2d(xv, wc, jnp.zeros((16,), jnp.float32))
    assert _max_rel_err(got, ref) < 5e-2, "conv2d mismatch"

    Cp16 = _round_up(16, 128)
    bn_t = (jnp.pad(gamma, (0, Cp16 - 16)), jnp.pad(beta, (0, Cp16 - 16)))
    got = jax.jit(lambda x: conv2d(x, cp_c, bn=bn_t, post_bn="leaky"))(
        xv.astype(jnp.bfloat16))
    ref_b = _ref_bn(ref, gamma, beta)
    ref_b = jnp.where(ref_b > 0, ref_b, 0.2 * ref_b)
    assert _max_rel_err(got, ref_b) < 5e-2, "conv2d+batchnorm mismatch"

    xv2 = jax.random.normal(kv1, (2, 8, 8, 16), jnp.float32)
    cp_t = _convT_params(wt, bt)
    got = jax.jit(lambda x: conv_transpose2d(x, cp_t, out_dtype=jnp.float32))(
        xv2.astype(jnp.bfloat16))
    ref = _ref_conv_transpose2d(xv2, wt, bt)
    assert _max_rel_err(got, ref) < 5e-2, "conv_transpose2d mismatch"

    # ---- full UnetGenerator forward -------------------------------------------
    input_nc, output_nc, num_downs, ngf = 3, 3, 5, 8
    B, S = 2, 32  # spatial must be divisible by 2**num_downs

    params = make_unet_params(kp, input_nc, output_nc, num_downs, ngf=ngf)

    # Inputs follow the PyTorch NCHW convention; kernels run in NHWC / bf16.
    x_nchw = jax.random.normal(kx, (B, input_nc, S, S), jnp.float32)
    x_nhwc = jnp.transpose(x_nchw, (0, 2, 3, 1))

    fwd = jax.jit(lambda inp: unet_forward(params, inp.astype(jnp.bfloat16)))
    y_nhwc = fwd(x_nhwc)
    y_nchw = jax.block_until_ready(jnp.transpose(y_nhwc, (0, 3, 1, 2)))

    assert y_nchw.shape == (B, output_nc, S, S), y_nchw.shape
    assert y_nchw.dtype == jnp.float32
    assert bool(jnp.all(jnp.isfinite(y_nchw)))
    print("KERNEL_OK")
</pallas_src>

<mosaic_0001>
module attributes {stable_mosaic.version = 11 : i64} {
  func.func @_mm_kernel(%arg0: i32, %arg1: i32, %arg2: i32, %arg3: i32, %arg4: memref<1x128x128xbf16, #tpu.memory_space<vmem>>, %arg5: memref<1x128x128xbf16, #tpu.memory_space<vmem>>, %arg6: memref<1x128xf32, #tpu.memory_space<vmem>>, %arg7: memref<1x128x128xbf16, #tpu.memory_space<vmem>>, %arg8: memref<128x128xf32, #tpu.memory_space<vmem>>) attributes {dimension_semantics = [#tpu.dimension_semantics<parallel>, #tpu.dimension_semantics<parallel>, #tpu.dimension_semantics<parallel>, #tpu.dimension_semantics<arbitrary>], iteration_bounds = array<i64: 1, 1, 1, 1>, scalar_prefetch = 0 : i64, scratch_operands = 1 : i64, tpu.core_type = #tpu.core_type<tc>, window_params = [{transform_indices = @transform_0, window_bounds = array<i64: 1, 128, 128>}, {transform_indices = @transform_1, window_bounds = array<i64: 1, 128, 128>}, {transform_indices = @transform_2, window_bounds = array<i64: 1, 128>}, {transform_indices = @transform_3, window_bounds = array<i64: 1, 128, 128>}]} {
    %c0_i32 = arith.constant 0 : i32
    %0 = arith.cmpi eq, %arg3, %c0_i32 : i32
    %1 = arith.extui %0 : i1 to i32
    %c0_i32_0 = arith.constant 0 : i32
    %2 = arith.cmpi ne, %1, %c0_i32_0 : i32
    scf.if %2 {
      %cst_12 = arith.constant 0.000000e+00 : f32
      %14 = vector.broadcast %cst_12 : f32 to vector<128x128xf32>
      %c0_13 = arith.constant 0 : index
      %c0_14 = arith.constant 0 : index
      %15 = vector.load %arg8[%c0_13, %c0_14] : memref<128x128xf32, #tpu.memory_space<vmem>>, vector<128x128xf32>
      tpu.vector_store %arg8[%c0_13, %c0_14], %14 {strides = array<i32>} : memref<128x128xf32, #tpu.memory_space<vmem>>, vector<128x128xf32>,
    } else {
    }
    %c0 = arith.constant 0 : index
    %c0_1 = arith.constant 0 : index
    %c0_2 = arith.constant 0 : index
    %3 = vector.load %arg4[%c0, %c0_1, %c0_2] : memref<1x128x128xbf16, #tpu.memory_space<vmem>>, vector<1x128x128xbf16>
    %4 = vector.shape_cast %3 : vector<1x128x128xbf16> to vector<128x128xbf16>
    %c0_3 = arith.constant 0 : index
    %c0_4 = arith.constant 0 : index
    %5 = vector.load %arg8[%c0_3, %c0_4] : memref<128x128xf32, #tpu.memory_space<vmem>>, vector<128x128xf32>
    %c0_5 = arith.constant 0 : index
    %c0_6 = arith.constant 0 : index
    %c0_7 = arith.constant 0 : index
    %6 = vector.load %arg5[%c0_5, %c0_6, %c0_7] : memref<1x128x128xbf16, #tpu.memory_space<vmem>>, vector<1x128x128xbf16>
    %7 = vector.shape_cast %6 : vector<1x128x128xbf16> to vector<128x128xbf16>
    %cst = arith.constant dense<0.000000e+00> : vector<128x128xf32>
    %8 = tpu.matmul %4, %7, %cst {dimension_numbers = #tpu.dot_dimension_numbers<[1], [0], [0], [1], [0, 0, 1, 1], [], []>} : vector<128x128xbf16>, vector<128x128xbf16>, vector<128x128xf32> -> vector<128x128xf32>
    %9 = arith.addf %5, %8 : vector<128x128xf32>
    %c0_8 = arith.constant 0 : index
    %c0_9 = arith.constant 0 : index
    %10 = vector.load %arg8[%c0_8, %c0_9] : memref<128x128xf32, #tpu.memory_space<vmem>>, vector<128x128xf32>
    tpu.vector_store %arg8[%c0_8, %c0_9], %9 {strides = array<i32>} : memref<128x128xf32, #tpu.memory_space<vmem>>, vector<128x128xf32>,
    %c0_i32_10 = arith.constant 0 : i32
    %11 = arith.cmpi eq, %arg3, %c0_i32_10 : i32
    %12 = arith.extui %11 : i1 to i32
    %c0_i32_11 = arith.constant 0 : i32
    %13 = arith.cmpi ne, %12, %c0_i32_11 : i32
    scf.if %13 {
      %c0_12 = arith.constant 0 : index
      %c0_13 = arith.constant 0 : index
      %14 = vector.load %arg8[%c0_12, %c0_13] : memref<128x128xf32, #tpu.memory_space<vmem>>, vector<128x128xf32>
      %c0_14 = arith.constant 0 : index
      %c0_15 = arith.constant 0 : index
      %15 = vector.load %arg6[%c0_14, %c0_15] : memref<1x128xf32, #tpu.memory_space<vmem>>, vector<1x128xf32>
      %16 = vector.broadcast %15 : vector<1x128xf32> to vector<128x128xf32>
      %17 = arith.addf %14, %16 : vector<128x128xf32>
      %18 = arith.truncf %17 : vector<128x128xf32> to vector<128x128xbf16>
      %c0_16 = arith.constant 0 : index
      %c0_17 = arith.constant 0 : index
      %c0_18 = arith.constant 0 : index
      %19 = vector.load %arg7[%c0_16, %c0_17, %c0_18] : memref<1x128x128xbf16, #tpu.memory_space<vmem>>, vector<1x128x128xbf16>
      %20 = vector.shape_cast %19 : vector<1x128x128xbf16> to vector<128x128xbf16>
      %21 = vector.shape_cast %18 : vector<128x128xbf16> to vector<1x128x128xbf16>
      tpu.vector_store %arg7[%c0_16, %c0_17, %c0_18], %21 {strides = array<i32>} : memref<1x128x128xbf16, #tpu.memory_space<vmem>>, vector<1x128x128xbf16>,
    } else {
    }
    return
  }
  func.func @transform_0(%arg0: i32, %arg1: i32, %arg2: i32, %arg3: i32) -> (i32, i32, i32) {
    %c0_i32 = arith.constant 0 : i32
    return %arg0, %arg1, %arg3 : i32, i32, i32
  }
  func.func @transform_1(%arg0: i32, %arg1: i32, %arg2: i32, %arg3: i32) -> (i32, i32, i32) {
    %c0_i32 = arith.constant 0 : i32
    return %arg0, %arg3, %arg2 : i32, i32, i32
  }
  func.func @transform_2(%arg0: i32, %arg1: i32, %arg2: i32, %arg3: i32) -> (i32, i32) {
    %c0_i32 = arith.constant 0 : i32
    %c0_i32_0 = arith.constant 0 : i32
    return %c0_i32, %arg2 : i32, i32
  }
  func.func @transform_3(%arg0: i32, %arg1: i32, %arg2: i32, %arg3: i32) -> (i32, i32, i32) {
    %c0_i32 = arith.constant 0 : i32
    return %arg0, %arg1, %arg2 : i32, i32, i32
  }
}

</mosaic_0001>

<bundles_post_ra>
// kernel: _lambda_.1
= control target key start
LH: loop header
LB: loop body
LE: loop exit
PB: predicated region body
PF: predicated region fallthrough
CT: control target
= control target key end

     0   :  { %s736_s0 = inlined_call_operand.vmem [shape: bf16[1,128,128], index: 0, kind: input, shape index: {}]   ;;  %s737_s1 = inlined_call_operand.vmem [shape: bf16[1,128,128], index: 1, kind: input, shape index: {}]   ;;  %s738_s2 = inlined_call_operand.vmem [shape: f32[1,128], index: 2, kind: input, shape index: {}]   ;;  %s739_s3 = inlined_call_operand.hbm [shape: bf16[1,128,128], index: 3, kind: output, shape index: {}]  }
   0x1   :  { %v610_v0 = vld [vmem:[%s737_s1] sm:$0xff]   ;;  %v611_v1 = vld [vmem:[%s737_s1 + $0x8] sm:$0xff]   ;;  %v612_v2 = vld [vmem:[%s737_s1 + $0x10] sm:$0xff]  }
   0x2   :  { %559 = vmatprep.subr.bf16.mxu0 %v610_v0  ;;  %591 = vmatprep.subr.bf16.mxu1 %v610_v0  ;;  %v613_v3 = vld [vmem:[%s737_s1 + $0x18] sm:$0xff]   ;;  %v618_v4 = vld [vmem:[%s736_s0] sm:$0xff]   ;;  %v615_v7 = vld [vmem:[%s737_s1 + $0x28] sm:$0xff]  }
   0x3   :  { %560 = vmatpush3.bf16.msra.mxu0 %v610_v0  ;;  %599 = vmatpush3.bf16.msra.mxu1 %v610_v0  ;;  %v619_v5 = vld [vmem:[%s736_s0 + $0x20] sm:$0xff]  }
   0x4   :  { %561 = vmatprep.subr.bf16.mxu0 %v611_v1  ;;  %592 = vmatprep.subr.bf16.mxu1 %v611_v1  ;;  %v614_v6 = vld [vmem:[%s737_s1 + $0x20] sm:$0xff]  }
   0x5   :  { %575 = vmatprep.mubr.bf16.mxu0 %v618_v4  ;;  %583 = vmatprep.mubr.bf16.mxu1 %v619_v5 }
   0x7   :  { %562 = vmatpush3.bf16.msra.mxu0 %v611_v1  ;;  %600 = vmatpush3.bf16.msra.mxu1 %v611_v1 }
   0x8   :  { %563 = vmatprep.subr.bf16.mxu0 %v612_v2  ;;  %593 = vmatprep.subr.bf16.mxu1 %v612_v2 }
   0xb   :  { %564 = vmatpush3.bf16.msra.mxu0 %v612_v2  ;;  %601 = vmatpush3.bf16.msra.mxu1 %v612_v2 }
   0xc   :  { %565 = vmatprep.subr.bf16.mxu0 %v613_v3  ;;  %594 = vmatprep.subr.bf16.mxu1 %v613_v3 }
   0xf   :  { %566 = vmatpush3.bf16.msra.mxu0 %v613_v3  ;;  %602 = vmatpush3.bf16.msra.mxu1 %v613_v3 }
  0x10   :  { %567 = vmatprep.subr.bf16.mxu0 %v614_v6  ;;  %595 = vmatprep.subr.bf16.mxu1 %v614_v6 }
  0x11   :  { %8 = vsyncpa [#allocation4], 0  ;;  %v616_v8 = vld [vmem:[%s737_s1 + $0x30] sm:$0xff]   ;;  %v617_v9 = vld [vmem:[%s737_s1 + $0x38] sm:$0xff]  }
  0x12   :  { %v620_v10 = vld [vmem:[%s736_s0 + $0x8] sm:$0xff]   ;;  %v622_v12 = vld [vmem:[%s736_s0 + $0x10] sm:$0xff]   ;;  %v624_v14 = vld [vmem:[%s736_s0 + $0x18] sm:$0xff]  }
  0x13   :  { %568 = vmatpush3.bf16.msra.mxu0 %v614_v6  ;;  %603 = vmatpush3.bf16.msra.mxu1 %v614_v6  ;;  %v621_v11 = vld [vmem:[%s736_s0 + $0x28] sm:$0xff]   ;;  %v623_v13 = vld [vmem:[%s736_s0 + $0x30] sm:$0xff]   ;;  %v625_v15 = vld [vmem:[%s736_s0 + $0x38] sm:$0xff]   ;;  %s650_s0 = smov [#allocation3]  }
  0x14   :  { %569 = vmatprep.subr.bf16.mxu0 %v615_v7  ;;  %596 = vmatprep.subr.bf16.mxu1 %v615_v7  ;;  %v463_v17 = vld [vmem:[%s738_s2] ss:$0 sm:$0xff]  ;;  %s436_s2 = sshll.u32 %s650_s0, 4  ;;  %s437_s2 = int_to_ptr.vmem [resolvable:$true] %s436_s2 }
  0x15   :  { %s626_s18 = scalar_lea.vmem %s437_s2, 1024  ;;  %p631_p1 = scmp.lt.s32.totalorder %s437_s2, %s437_s2 }
  0x16   :  { %p627_p0 = scmp.ne.s32.totalorder %s437_s2, %s626_s18  ;;  %p632_p2 = scmp.lt.s32.totalorder %s626_s18, %s626_s18 }
  0x17   :  { %570 = vmatpush3.bf16.msra.mxu0 %v615_v7  ;;  %604 = vmatpush3.bf16.msra.mxu1 %v615_v7 }
  0x18   :  { %571 = vmatprep.subr.bf16.mxu0 %v616_v8  ;;  %597 = vmatprep.subr.bf16.mxu1 %v616_v8  ;;  %p633_p3 = por %p632_p2, %p631_p1 }
  0x1a   :  { %p634_p4 = pnand %p633_p3, %p627_p0 }
  0x1b   :  { %572 = vmatpush3.bf16.msra.mxu0 %v616_v8  ;;  %605 = vmatpush3.bf16.msra.mxu1 %v616_v8 }
  0x1c   :  { %573 = vmatprep.subr.bf16.mxu0 %v617_v9  ;;  %598 = vmatprep.subr.bf16.mxu1 %v617_v9 }
  0x1f   :  { %574 = vmatpush3.bf16.msra.mxu0 %v617_v9  ;;  %606 = vmatpush3.bf16.msra.mxu1 %v617_v9 }
  0x22   :  { %576 = vmatmul.mubr.bf16.vlgmr.msra.gmra.mrb[0].mxu0 %v620_v10  ;;  %584 = vmatmul.mubr.bf16.vlgmr.msra.gmra.mrb[0].mxu1 %v621_v11 }
  0x23   :  { %579 = vmatprep.mubr.bf16.mxu0 %v622_v12  ;;  %587 = vmatprep.mubr.bf16.mxu1 %v623_v13 }
  0x2a   :  { %580 = vmatmul.mubr.bf16.gmra.mrb[4].mxu0 %v624_v14  ;;  %588 = vmatmul.mubr.bf16.gmra.mrb[4].mxu1 %v625_v15 }
  0xf5   :  { %v577_v16 = vpop.f32.mrb[0].mxu0  ;;  %v585_v18 = vpop.f32.mrb[0].mxu1 }
  0xf6   :  { %v214_v19 = vpop.f32.mrb[1].mxu0  ;;  %v246_v20 = vpop.f32.mrb[1].mxu1  ;;  %v337_v23 = vadd.f32 %v577_v16, %v463_v17  ;;  %v345_v24 = vadd.f32 %v585_v18, %v463_v17 }
  0xf7   :  { %v578_v21 = vpop.f32.mrb[2].mxu0  ;;  %v586_v22 = vpop.f32.mrb[2].mxu1  ;;  %v335_v29 = vadd.f32 %v463_v17, %v214_v19  ;;  %v343_v30 = vadd.f32 %v463_v17, %v246_v20 }
  0xf8   :  { %v338_v25 = vadd.f32 %v578_v21, %v463_v17  ;;  %v346_v26 = vadd.f32 %v586_v22, %v463_v17  ;;  %v217_v27 = vpop.f32.mrb[3].mxu0  ;;  %v249_v28 = vpop.f32.mrb[3].mxu1 }
  0xf9   :  { %v336_v31 = vadd.f32 %v463_v17, %v217_v27  ;;  %v344_v32 = vadd.f32 %v463_v17, %v249_v28 }
  0xfa   :  { %v504_v33 = vpack.c.bf16 %v338_v25, %v337_v23  ;;  %v524_v34 = vpack.c.bf16 %v346_v26, %v345_v24 }
  0xfb   :  { %v499_v35 = vpack.c.bf16 %v336_v31, %v335_v29  ;;  %v519_v36 = vpack.c.bf16 %v344_v32, %v343_v30 }
  0xfc   :  { %536 = vst [vmem:[#allocation3 + $0x8] sm:$0xff] %v504_v33   ;;  %540 = vst [vmem:[#allocation3 + $0x28] sm:$0xff] %v524_v34  }
  0xfd   :  { %500 = vst [vmem:[#allocation3] sm:$0xff] %v499_v35   ;;  %539 = vst [vmem:[#allocation3 + $0x20] sm:$0xff] %v519_v36   ;;  %v581_v37 = vpop.f32.mrb[4].mxu0  ;;  %v589_v38 = vpop.f32.mrb[4].mxu1 }
  0xfe   :  { %v230_v39 = vpop.f32.mrb[5].mxu0  ;;  %v262_v40 = vpop.f32.mrb[5].mxu1  ;;  %v341_v43 = vadd.f32 %v581_v37, %v463_v17  ;;  %v349_v44 = vadd.f32 %v589_v38, %v463_v17 }
  0xff   :  { %v582_v41 = vpop.f32.mrb[6].mxu0  ;;  %v590_v42 = vpop.f32.mrb[6].mxu1  ;;  %v339_v49 = vadd.f32 %v463_v17, %v230_v39  ;;  %v347_v50 = vadd.f32 %v463_v17, %v262_v40 }
 0x100   :  { %v342_v45 = vadd.f32 %v582_v41, %v463_v17  ;;  %v350_v46 = vadd.f32 %v590_v42, %v463_v17  ;;  %v233_v47 = vpop.f32.mrb[7].mxu0  ;;  %v265_v48 = vpop.f32.mrb[7].mxu1 }
 0x101   :  { %v340_v51 = vadd.f32 %v463_v17, %v233_v47  ;;  %v348_v52 = vadd.f32 %v463_v17, %v265_v48 }
 0x102   :  { %v514_v53 = vpack.c.bf16 %v342_v45, %v341_v43  ;;  %v534_v54 = vpack.c.bf16 %v350_v46, %v349_v44 }
 0x103   :  { %v509_v55 = vpack.c.bf16 %v340_v51, %v339_v49  ;;  %v529_v56 = vpack.c.bf16 %v348_v52, %v347_v50 }
 0x104   :  { %538 = vst [vmem:[#allocation3 + $0x18] sm:$0xff] %v514_v53   ;;  %542 = vst [vmem:[#allocation3 + $0x38] sm:$0xff] %v534_v54  }
 0x105   :  { %537 = vst [vmem:[#allocation3 + $0x10] sm:$0xff] %v509_v55   ;;  %541 = vst [vmem:[#allocation3 + $0x30] sm:$0xff] %v529_v56  }
 0x106   :  { %637 = shalt.err (!%p634_p4)
}
 0x107   :  { %s638_s21 = scalar_lea.hbm %s739_s3, 1024 }
 0x108   :  { %p639_p5 = scmp.ne.s32.totalorder %s739_s3, %s638_s21  ;;  %p642_p6 = scmp.lt.u32.totalorder %s638_s21, %s739_s3 }
 0x10a   :  { %p644_p7 = pnand %p642_p6, %p639_p5 }
 0x10c   :  { %647 = shalt.err (!%p644_p7)
}
 0x10d   :  { %s651_s26 = smov 64   ;;  %s652_s27 = smov 4  }
 0x10e   :  { %442 = dma.vmem_to_hbm [thread:$0]  %s437_s2, 1024, %s739_s3, [#allocation4], %s651_s26, %s651_s26, %s652_s27  }
 0x10f   :  { %648 = dma.done.wait [#allocation4], 1024  }
 0x110   :  { %649 = vsyncadd [#allocation4], 4294966272 }
 0x111   :  { %446 = vsyncpa [#allocation4], 1 }

</bundles_post_ra>
